<compile_context>
chip_gen: v5e
topology: v5e:2x2
jax: 0.10.0
libtpu: 0.0.40
codegen_flags: <defaults>
</compile_context>

<pallas_src>
import functools

import jax
import jax.numpy as jnp
from jax import lax
from jax.experimental import pallas as pl
from jax.experimental.pallas import tpu as pltpu


def _round_up(x, m):
    return ((x + m - 1) // m) * m


def _critic_kernel(n_layers, compute_dtype, *refs):
    """Fused MLP forward over one batch tile.

    refs = (x_ref, w1, b1, ..., wL, bL, out_ref)
      x_ref : (TB, obs_dim)   compute_dtype
      w_i   : (in_i, out_i)   compute_dtype   (hidden layers)
      b_i   : (1, out_i)      float32
      w_L   : (1, H_last)     compute_dtype   (final layer, row form)
      b_L   : (1, 1)          float32
      out   : (1, TB)         float32         (lane-dense value slab)
    """
    x_ref = refs[0]
    out_ref = refs[-1]
    param_refs = refs[1:-1]

    h = x_ref[...].astype(compute_dtype)

    # Hidden layers: y = tanh(x @ W + b); matmul operands in compute_dtype,
    # f32 accumulation, bias add + tanh in f32.
    for layer in range(n_layers - 1):
        w = param_refs[2 * layer][...]
        b = param_refs[2 * layer + 1][...]
        y = jnp.dot(h, w, preferred_element_type=jnp.float32) + b
        h = jnp.tanh(y).astype(compute_dtype)

    # Final value-head layer, emitted lane-dense as (1, TB):
    #   (1, H) . (TB, H) contracting the H axes  ->  (1, TB)
    w_last = param_refs[2 * (n_layers - 1)][...]        # (1, H)
    b_last = param_refs[2 * (n_layers - 1) + 1][...]    # (1, 1)
    v = lax.dot_general(w_last, h,
                        dimension_numbers=(((1,), (1,)), ((), ())),
                        preferred_element_type=jnp.float32)
    out_ref[...] = (v + b_last).astype(out_ref.dtype)


def mlp_critic_forward(obs, params, *, tile_batch=1024,
                       compute_dtype=jnp.bfloat16):
    """MLPCritic forward.

    obs    : (B, obs_dim) float32
    params : list of (W, b) with W stored as (in_features, out_features)
             (y = x @ W + b, semantically identical to PyTorch's x @ W.T + b).
    Returns (B,) float32 values (squeeze(-1) of the final linear layer).
    """
    B, obs_dim = obs.shape
    n_layers = len(params)

    # Batch tile: multiple of 128 (lane-dense output slab), capped at tile_batch.
    TB = min(int(tile_batch), _round_up(B, 128))
    TB = _round_up(TB, 128)
    B_pad = _round_up(B, TB)
    if B_pad != B:
        obs = jnp.pad(obs, ((0, B_pad - B), (0, 0)))
    grid = (B_pad // TB,)

    obs = obs.astype(compute_dtype)  # halves HBM bytes for the streamed input

    flat_params = []
    in_specs = [pl.BlockSpec((TB, obs_dim), lambda i: (i, 0))]
    for li, (w, b) in enumerate(params):
        if li == n_layers - 1:
            w_arr = w.T.astype(compute_dtype)                # (1, H) row form
            b_arr = b.reshape(1, 1).astype(jnp.float32)
        else:
            w_arr = w.astype(compute_dtype)                  # (in, out)
            b_arr = b.reshape(1, -1).astype(jnp.float32)
        flat_params += [w_arr, b_arr]
        # Full-array blocks with constant index_map -> params stay resident in
        # VMEM across the whole grid (fetched once, never re-DMA'd).
        in_specs += [pl.BlockSpec(w_arr.shape, lambda i: (0, 0)),
                     pl.BlockSpec(b_arr.shape, lambda i: (0, 0))]

    out_spec = pl.BlockSpec((1, TB), lambda i: (0, i))

    # Explicit VMEM budget: double-buffered obs/out tiles + resident params +
    # f32 intermediates, with generous headroom (kept well below v7x's 64 MiB).
    itemsize = jnp.dtype(compute_dtype).itemsize
    bytes_obs = 2 * TB * obs_dim * itemsize
    bytes_out = 2 * TB * 4
    bytes_params = sum(int(a.size) * a.dtype.itemsize for a in flat_params)
    widest = max(int(w.shape[1]) for w, _ in params)
    bytes_work = 4 * TB * max(widest, obs_dim) * 4
    vmem_limit = min((8 << 20) + 2 * (bytes_obs + bytes_out + bytes_params +
                                      bytes_work), 48 << 20)

    kernel = functools.partial(_critic_kernel, n_layers, compute_dtype)
    v = pl.pallas_call(
        kernel,
        out_shape=jax.ShapeDtypeStruct((1, B_pad), jnp.float32),
        grid=grid,
        in_specs=in_specs,
        out_specs=out_spec,
        compiler_params=pltpu.CompilerParams(
            dimension_semantics=("parallel",),
            vmem_limit_bytes=int(vmem_limit)),
    )(obs, *flat_params)

    # torch.squeeze(v, -1): (1, B_pad) slab -> (B,)
    return v.reshape(B_pad)[:B]


def init_params(key, sizes):
    """Deterministic init for Linear layers; W stored as (in, out)."""
    params = []
    for j in range(len(sizes) - 1):
        key, kw, kb = jax.random.split(key, 3)
        fan_in = sizes[j]
        bound = 1.0 / jnp.sqrt(fan_in)
        w = jax.random.uniform(kw, (sizes[j], sizes[j + 1]),
                               minval=-bound, maxval=bound, dtype=jnp.float32)
        b = jax.random.uniform(kb, (sizes[j + 1],),
                               minval=-bound, maxval=bound, dtype=jnp.float32)
        params.append((w, b))
    return params


def reference_forward(obs, params):
    """Plain-JAX f32 reference of the same MLPCritic forward (tanh hidden)."""
    h = obs.astype(jnp.float32)
    n = len(params)
    for i, (w, b) in enumerate(params):
        h = jnp.dot(h, w, precision=lax.Precision.HIGHEST) + b
        if i < n - 1:
            h = jnp.tanh(h)
    return jnp.squeeze(h, -1)


if __name__ == "__main__":
    key = jax.random.PRNGKey(0)

    # Shapes consistent with the module: obs_dim=16, hidden_sizes=(32, 32).
    obs_dim = 16
    hidden_sizes = (32, 32)
    sizes = [obs_dim] + list(hidden_sizes) + [1]

    key, k_obs, k_obs2 = jax.random.split(key, 3)
    params = init_params(key, sizes)

    # Small batch (single tile), both bf16 (production) and f32 paths.
    obs_small = jax.random.normal(k_obs, (8, obs_dim), dtype=jnp.float32)
    v_bf16 = jax.block_until_ready(mlp_critic_forward(obs_small, params))
    v_f32 = jax.block_until_ready(
        mlp_critic_forward(obs_small, params, compute_dtype=jnp.float32))
    v_ref = reference_forward(obs_small, params)
    assert v_bf16.shape == (8,), v_bf16.shape
    assert jnp.allclose(v_f32, v_ref, atol=1e-2, rtol=1e-2), (v_f32, v_ref)
    assert jnp.allclose(v_bf16, v_ref, atol=5e-2, rtol=5e-2), (v_bf16, v_ref)

    # Larger, non-multiple batch exercising the tiled grid + padding path.
    obs_big = jax.random.normal(k_obs2, (300, obs_dim), dtype=jnp.float32)
    v_big = jax.block_until_ready(
        mlp_critic_forward(obs_big, params, tile_batch=128))
    v_big_ref = reference_forward(obs_big, params)
    assert v_big.shape == (300,), v_big.shape
    assert jnp.allclose(v_big, v_big_ref, atol=5e-2, rtol=5e-2), \
        float(jnp.max(jnp.abs(v_big - v_big_ref)))

    print("KERNEL_OK")
</pallas_src>

<mosaic_0001>
module attributes {stable_mosaic.version = 11 : i64} {
  func.func @_critic_kernel(%arg0: i32, %arg1: memref<128x16xbf16, #tpu.memory_space<vmem>>, %arg2: memref<16x32xbf16, #tpu.memory_space<vmem>>, %arg3: memref<1x32xf32, #tpu.memory_space<vmem>>, %arg4: memref<32x32xbf16, #tpu.memory_space<vmem>>, %arg5: memref<1x32xf32, #tpu.memory_space<vmem>>, %arg6: memref<1x32xbf16, #tpu.memory_space<vmem>>, %arg7: memref<1x1xf32, #tpu.memory_space<vmem>>, %arg8: memref<1x128xf32, #tpu.memory_space<vmem>>) attributes {dimension_semantics = [#tpu.dimension_semantics<parallel>], iteration_bounds = array<i64: 1>, scalar_prefetch = 0 : i64, scratch_operands = 0 : i64, tpu.core_type = #tpu.core_type<tc>, window_params = [{transform_indices = @transform_0, window_bounds = array<i64: 128, 16>}, {pipeline_mode = #tpu.pipeline_mode<synchronous>, transform_indices = @transform_1, window_bounds = array<i64: 16, 32>}, {pipeline_mode = #tpu.pipeline_mode<synchronous>, transform_indices = @transform_2, window_bounds = array<i64: 1, 32>}, {pipeline_mode = #tpu.pipeline_mode<synchronous>, transform_indices = @transform_3, window_bounds = array<i64: 32, 32>}, {pipeline_mode = #tpu.pipeline_mode<synchronous>, transform_indices = @transform_4, window_bounds = array<i64: 1, 32>}, {pipeline_mode = #tpu.pipeline_mode<synchronous>, transform_indices = @transform_5, window_bounds = array<i64: 1, 32>}, {pipeline_mode = #tpu.pipeline_mode<synchronous>, transform_indices = @transform_6, window_bounds = array<i64: 1, 1>}, {transform_indices = @transform_7, window_bounds = array<i64: 1, 128>}]} {
    %c0 = arith.constant 0 : index
    %c0_0 = arith.constant 0 : index
    %0 = vector.load %arg1[%c0, %c0_0] : memref<128x16xbf16, #tpu.memory_space<vmem>>, vector<128x16xbf16>
    %c0_1 = arith.constant 0 : index
    %c0_2 = arith.constant 0 : index
    %1 = vector.load %arg2[%c0_1, %c0_2] : memref<16x32xbf16, #tpu.memory_space<vmem>>, vector<16x32xbf16>
    %c0_3 = arith.constant 0 : index
    %c0_4 = arith.constant 0 : index
    %2 = vector.load %arg3[%c0_3, %c0_4] : memref<1x32xf32, #tpu.memory_space<vmem>>, vector<1x32xf32>
    %cst = arith.constant dense<0.000000e+00> : vector<128x32xf32>
    %3 = tpu.matmul %0, %1, %cst {dimension_numbers = #tpu.dot_dimension_numbers<[1], [0], [0], [1], [0, 0, 1, 1], [], []>} : vector<128x16xbf16>, vector<16x32xbf16>, vector<128x32xf32> -> vector<128x32xf32>
    %4 = vector.broadcast %2 : vector<1x32xf32> to vector<128x32xf32>
    %5 = arith.addf %3, %4 : vector<128x32xf32>
    %6 = math.tanh %5 : vector<128x32xf32>
    %7 = arith.truncf %6 : vector<128x32xf32> to vector<128x32xbf16>
    %c0_5 = arith.constant 0 : index
    %c0_6 = arith.constant 0 : index
    %8 = vector.load %arg4[%c0_5, %c0_6] : memref<32x32xbf16, #tpu.memory_space<vmem>>, vector<32x32xbf16>
    %c0_7 = arith.constant 0 : index
    %c0_8 = arith.constant 0 : index
    %9 = vector.load %arg5[%c0_7, %c0_8] : memref<1x32xf32, #tpu.memory_space<vmem>>, vector<1x32xf32>
    %cst_9 = arith.constant dense<0.000000e+00> : vector<128x32xf32>
    %10 = tpu.matmul %7, %8, %cst_9 {dimension_numbers = #tpu.dot_dimension_numbers<[1], [0], [0], [1], [0, 0, 1, 1], [], []>} : vector<128x32xbf16>, vector<32x32xbf16>, vector<128x32xf32> -> vector<128x32xf32>
    %11 = vector.broadcast %9 : vector<1x32xf32> to vector<128x32xf32>
    %12 = arith.addf %10, %11 : vector<128x32xf32>
    %13 = math.tanh %12 : vector<128x32xf32>
    %14 = arith.truncf %13 : vector<128x32xf32> to vector<128x32xbf16>
    %c0_10 = arith.constant 0 : index
    %c0_11 = arith.constant 0 : index
    %15 = vector.load %arg6[%c0_10, %c0_11] : memref<1x32xbf16, #tpu.memory_space<vmem>>, vector<1x32xbf16>
    %c0_12 = arith.constant 0 : index
    %c0_13 = arith.constant 0 : index
    %16 = vector.load %arg7[%c0_12, %c0_13] : memref<1x1xf32, #tpu.memory_space<vmem>>, vector<1x1xf32>
    %cst_14 = arith.constant dense<0.000000e+00> : vector<1x128xf32>
    %17 = tpu.matmul %15, %14, %cst_14 {dimension_numbers = #tpu.dot_dimension_numbers<[1], [1], [0], [0], [0, 0, 1, 0], [], []>} : vector<1x32xbf16>, vector<128x32xbf16>, vector<1x128xf32> -> vector<1x128xf32>
    %18 = vector.broadcast %16 : vector<1x1xf32> to vector<1x128xf32>
    %19 = arith.addf %17, %18 : vector<1x128xf32>
    %c0_15 = arith.constant 0 : index
    %c0_16 = arith.constant 0 : index
    %20 = vector.load %arg8[%c0_15, %c0_16] : memref<1x128xf32, #tpu.memory_space<vmem>>, vector<1x128xf32>
    tpu.vector_store %arg8[%c0_15, %c0_16], %19 {strides = array<i32>} : memref<1x128xf32, #tpu.memory_space<vmem>>, vector<1x128xf32>,
    return
  }
  func.func @transform_0(%arg0: i32) -> (i32, i32) {
    %c0_i32 = arith.constant 0 : i32
    %c0_i32_0 = arith.constant 0 : i32
    return %arg0, %c0_i32 : i32, i32
  }
  func.func @transform_1(%arg0: i32) -> (i32, i32) {
    %c0_i32 = arith.constant 0 : i32
    %c0_i32_0 = arith.constant 0 : i32
    %c0_i32_1 = arith.constant 0 : i32
    return %c0_i32, %c0_i32_0 : i32, i32
  }
  func.func @transform_2(%arg0: i32) -> (i32, i32) {
    %c0_i32 = arith.constant 0 : i32
    %c0_i32_0 = arith.constant 0 : i32
    %c0_i32_1 = arith.constant 0 : i32
    return %c0_i32, %c0_i32_0 : i32, i32
  }
  func.func @transform_3(%arg0: i32) -> (i32, i32) {
    %c0_i32 = arith.constant 0 : i32
    %c0_i32_0 = arith.constant 0 : i32
    %c0_i32_1 = arith.constant 0 : i32
    return %c0_i32, %c0_i32_0 : i32, i32
  }
  func.func @transform_4(%arg0: i32) -> (i32, i32) {
    %c0_i32 = arith.constant 0 : i32
    %c0_i32_0 = arith.constant 0 : i32
    %c0_i32_1 = arith.constant 0 : i32
    return %c0_i32, %c0_i32_0 : i32, i32
  }
  func.func @transform_5(%arg0: i32) -> (i32, i32) {
    %c0_i32 = arith.constant 0 : i32
    %c0_i32_0 = arith.constant 0 : i32
    %c0_i32_1 = arith.constant 0 : i32
    return %c0_i32, %c0_i32_0 : i32, i32
  }
  func.func @transform_6(%arg0: i32) -> (i32, i32) {
    %c0_i32 = arith.constant 0 : i32
    %c0_i32_0 = arith.constant 0 : i32
    %c0_i32_1 = arith.constant 0 : i32
    return %c0_i32, %c0_i32_0 : i32, i32
  }
  func.func @transform_7(%arg0: i32) -> (i32, i32) {
    %c0_i32 = arith.constant 0 : i32
    %c0_i32_0 = arith.constant 0 : i32
    return %c0_i32, %arg0 : i32, i32
  }
}

</mosaic_0001>

<bundles_post_ra>
// kernel: tpu_custom_call.1
= control target key start
LH: loop header
LB: loop body
LE: loop exit
PB: predicated region body
PF: predicated region fallthrough
CT: control target
= control target key end

     0   :  { %s718_s0 = inlined_call_operand.vmem [shape: bf16[128,16], index: 0, kind: input, shape index: {}]   ;;  %s719_s1 = inlined_call_operand.vmem [shape: bf16[16,32], index: 1, kind: input, shape index: {}]   ;;  %s720_s2 = inlined_call_operand.vmem [shape: f32[1,32], index: 2, kind: input, shape index: {}]   ;;  %s721_s3 = inlined_call_operand.vmem [shape: bf16[32,32], index: 3, kind: input, shape index: {}]   ;;  %s722_s4 = inlined_call_operand.vmem [shape: f32[1,32], index: 4, kind: input, shape index: {}]   ;;  %s723_s5 = inlined_call_operand.vmem [shape: bf16[1,32], index: 5, kind: input, shape index: {}]   ;;  %s724_s6 = inlined_call_operand.<no memory space> [shape: f32[1,1], index: 6, kind: input, shape index: {}]   ;;  %s725_s7 = inlined_call_operand.hbm [shape: f32[1,128], index: 7, kind: output, shape index: {}]  }
   0x1   :  { %v12_v0 = vstv %s724_s6 }
   0x2   :  { %13 = vst [vmem:[#allocation2] sm:$0x1] %v12_v0 }
   0x3   :  { %v448_v1 = vld [vmem:[%s719_s1] sm:$0xff]  ;;  %vm98_vm0 = vcmask 130048  }
   0x4   :  { %v440_v2 = vld [vmem:[%s718_s0] sm:$0xff]  ;;  %130 = vmatpush.bf16.msra.mxu0 %v448_v1  ;;  %451 = vmatpush.bf16.msra.mxu3 %v448_v1 }
   0x5   :  { %14 = vsyncpa [#allocation4], 0  ;;  %v441_v3 = vld [vmem:[%s718_s0 + $0x8] sm:$0xff]  ;;  %v442_v4 = vld [vmem:[%s718_s0 + $0x10] sm:$0xff]  ;;  %vm216_vm1 = vcmask 261120   ;;  %s550_s25 = smov [#allocation3]  }
   0x6   :  { %v443_v5 = vld [vmem:[%s718_s0 + $0x18] sm:$0xff]  ;;  %v446_v6 = vld [vmem:[%s718_s0 + $0x30] sm:$0xff]  ;;  %v444_v7 = vld [vmem:[%s718_s0 + $0x20] sm:$0xff]  ;;  %s368_s26 = sshll.u32 %s550_s25, 4  ;;  %s370_s29 = sshll.u32 %s725_s7, 4  ;;  %s369_s26 = int_to_ptr.vmem [resolvable:$true] %s368_s26  ;;  %s371_s29 = int_to_ptr.hbm [resolvable:$true] %s370_s29 }
   0x7   :  { %415 = vmatmul.msk.bf16.vlgmr.msra.gmra.mxu0 %vm98_vm0, %v440_v2  ;;  %421 = vmatmul.msk.bf16.vlgmr.msra.gmra.mxu3 %vm98_vm0, %v446_v6  ;;  %v447_v8 = vld [vmem:[%s718_s0 + $0x38] sm:$0xff]  ;;  %v445_v9 = vld [vmem:[%s718_s0 + $0x28] sm:$0xff]  ;;  %v449_v11 = vld [vmem:[%s721_s3] sm:$0xff] }
   0x8   :  { %v450_v10 = vld [vmem:[%s721_s3 + $0x8] sm:$0xff]  ;;  %v638_v13 = vld [vmem:[%s720_s2] ss:$0 sm:$0xff] }
   0x9   :  { %247 = vmatpush.bf16.msra.mxu1 %v450_v10  ;;  %452 = vmatpush.bf16.msrb.mxu3 %v450_v10  ;;  %v667_v6 = vld [vmem:[%s722_s4] ss:$0 sm:$0xff] }
   0xd   :  { %248 = vmatpush.bf16.msra.mxu1 %v449_v11  ;;  %453 = vmatpush.bf16.msrb.mxu3 %v449_v11 }
  0x17   :  { %416 = vmatmul.msk.bf16.gmra.mxu0 %vm98_vm0, %v441_v3  ;;  %422 = vmatmul.msk.bf16.gmra.mxu3 %vm98_vm0, %v447_v8 }
  0x27   :  { %417 = vmatmul.msk.bf16.gmra.mxu0 %vm98_vm0, %v442_v4 }
  0x37   :  { %418 = vmatmul.msk.bf16.gmra.mxu0 %vm98_vm0, %v443_v5 }
  0x47   :  { %419 = vmatmul.msk.bf16.gmra.mxu0 %vm98_vm0, %v444_v7 }
  0x57   :  { %420 = vmatmul.msk.bf16.gmra.mxu0 %vm98_vm0, %v445_v9 }
  0x84   :  { %v132_v12 = vpop.f32.mrf.mxu0 }
  0x85   :  { %v133_v14 = vadd.f32 %v638_v13, %v132_v12 }
  0x87   :  { %459 = vtanh.f32 %v133_v14 }
  0x8a   :  { %v162_v49 = vpop.f32.mrf.mxu3 }
  0x8b   :  { %v163_v57 = vadd.f32 %v638_v13, %v162_v49 }
  0x8c   :  { %v134_v15 = vpop.f32.mrf.mxu0 }
  0x8d   :  { %v135_v16 = vadd.f32 %v638_v13, %v134_v15  ;;  %v460_v17 = vpop.eup %459 }
  0x8f   :  { %461 = vtanh.f32 %v135_v16 }
  0x92   :  { %v164_v53 = vpop.f32.mrf.mxu3 }
  0x93   :  { %v165_v58 = vadd.f32 %v638_v13, %v164_v53 }
  0x94   :  { %v137_v18 = vpop.f32.mrf.mxu0 }
  0x95   :  { %v462_v19 = vpop.eup %461  ;;  %v138_v21 = vadd.f32 %v638_v13, %v137_v18 }
  0x96   :  { %v188_v20 = vpack.c.bf16 %v462_v19, %v460_v17 }
  0x97   :  { %463 = vtanh.f32 %v138_v21 }
  0x98   :  { %431 = vmatmul.msk.bf16.vlgmr.msra.gmra.mxu1 %vm216_vm1, %v188_v20 }
  0x9a   :  { %v167_v59 = vpop.f32.mrf.mxu3 }
  0x9b   :  { %v168_v0 = vadd.f32 %v638_v13, %v167_v59 }
  0x9c   :  { %v139_v22 = vpop.f32.mrf.mxu0 }
  0x9d   :  { %v140_v23 = vadd.f32 %v638_v13, %v139_v22  ;;  %v464_v24 = vpop.eup %463 }
  0x9f   :  { %465 = vtanh.f32 %v140_v23 }
  0xa2   :  { %v169_v62 = vpop.f32.mrf.mxu3 }
  0xa3   :  { %v170_v1 = vadd.f32 %v638_v13, %v169_v62 }
  0xa4   :  { %v142_v25 = vpop.f32.mrf.mxu0 }
  0xa5   :  { %v466_v26 = vpop.eup %465  ;;  %v143_v28 = vadd.f32 %v638_v13, %v142_v25 }
  0xa6   :  { %v189_v27 = vpack.c.bf16 %v466_v26, %v464_v24 }
  0xa7   :  { %467 = vtanh.f32 %v143_v28 }
  0xa8   :  { %432 = vmatmul.msk.bf16.gmra.mxu1 %vm216_vm1, %v189_v27 }
  0xac   :  { %v144_v29 = vpop.f32.mrf.mxu0 }
  0xad   :  { %v145_v30 = vadd.f32 %v638_v13, %v144_v29  ;;  %v468_v31 = vpop.eup %467 }
  0xaf   :  { %469 = vtanh.f32 %v145_v30 }
  0xb4   :  { %v147_v32 = vpop.f32.mrf.mxu0 }
  0xb5   :  { %v470_v33 = vpop.eup %469  ;;  %v148_v35 = vadd.f32 %v638_v13, %v147_v32 }
  0xb6   :  { %v190_v34 = vpack.c.bf16 %v470_v33, %v468_v31 }
  0xb7   :  { %471 = vtanh.f32 %v148_v35 }
  0xb8   :  { %433 = vmatmul.msk.bf16.gmra.mxu1 %vm216_vm1, %v190_v34 }
  0xbc   :  { %v149_v36 = vpop.f32.mrf.mxu0 }
  0xbd   :  { %v150_v37 = vadd.f32 %v638_v13, %v149_v36  ;;  %v472_v38 = vpop.eup %471 }
  0xbf   :  { %473 = vtanh.f32 %v150_v37 }
  0xc4   :  { %v152_v39 = vpop.f32.mrf.mxu0 }
  0xc5   :  { %v474_v40 = vpop.eup %473  ;;  %v153_v42 = vadd.f32 %v638_v13, %v152_v39 }
  0xc6   :  { %v191_v41 = vpack.c.bf16 %v474_v40, %v472_v38 }
  0xc7   :  { %475 = vtanh.f32 %v153_v42 }
  0xc8   :  { %434 = vmatmul.msk.bf16.gmra.mxu1 %vm216_vm1, %v191_v41 }
  0xcc   :  { %v154_v43 = vpop.f32.mrf.mxu0 }
  0xcd   :  { %v155_v44 = vadd.f32 %v638_v13, %v154_v43  ;;  %v476_v45 = vpop.eup %475 }
  0xcf   :  { %477 = vtanh.f32 %v155_v44 }
  0xd4   :  { %v157_v46 = vpop.f32.mrf.mxu0 }
  0xd5   :  { %v478_v47 = vpop.eup %477  ;;  %v158_v50 = vadd.f32 %v638_v13, %v157_v46 }
  0xd6   :  { %v192_v48 = vpack.c.bf16 %v478_v47, %v476_v45 }
  0xd7   :  { %479 = vtanh.f32 %v158_v50 }
  0xd8   :  { %435 = vmatmul.msk.bf16.gmra.mxu1 %vm216_vm1, %v192_v48 }
  0xdc   :  { %v159_v51 = vpop.f32.mrf.mxu0 }
  0xdd   :  { %v160_v52 = vadd.f32 %v638_v13, %v159_v51  ;;  %v480_v54 = vpop.eup %479 }
  0xdf   :  { %481 = vtanh.f32 %v160_v52 }
  0xe0   :  { %483 = vtanh.f32 %v163_v57 }
  0xe1   :  { %485 = vtanh.f32 %v165_v58 }
  0xe2   :  { %487 = vtanh.f32 %v168_v0  ;;  %v315_v0 = vld [vmem:[#allocation2] sm:$0x1] }
  0xe3   :  { %489 = vtanh.f32 %v170_v1 }
  0xe5   :  { %v482_v55 = vpop.eup %481 }
  0xe6   :  { %v193_v56 = vpack.c.bf16 %v482_v55, %v480_v54  ;;  %v484_v60 = vpop.eup %483 }
  0xe7   :  { %v486_v61 = vpop.eup %485 }
  0xe8   :  { %436 = vmatmul.msk.bf16.vlgmr.msrb.gmra.mxu3 %vm216_vm1, %v193_v56  ;;  %v194_v63 = vpack.c.bf16 %v486_v61, %v484_v60  ;;  %v488_v2 = vpop.eup %487 }
  0xe9   :  { %v490_v3 = vpop.eup %489 }
  0xea   :  { %v195_v4 = vpack.c.bf16 %v490_v3, %v488_v2  ;;  %v549_v2 = vmov 0  }
  0xeb   :  { %456 = vset.pattern.permute.xlu0 %v549_v2 }
  0xec   :  { %318 = vperm.xlu0 %456, %v315_v0  }
  0xf8   :  { %437 = vmatmul.msk.bf16.gmra.mxu3 %vm216_vm1, %v194_v63 }
 0x108   :  { %438 = vmatmul.msk.bf16.gmra.mxu3 %vm216_vm1, %v195_v4 }
 0x115   :  { %v250_v5 = vpop.f32.mrf.mxu1 }
 0x116   :  { %v251_v7 = vadd.f32 %v667_v6, %v250_v5 }
 0x118   :  { %491 = vtanh.f32 %v251_v7 }
 0x11d   :  { %v252_v8 = vpop.f32.mrf.mxu1 }
 0x11e   :  { %v253_v9 = vadd.f32 %v667_v6, %v252_v8  ;;  %v671_v10 = vpop.eup %491  ;;  %v314_v8 = vld [vmem:[%s723_s5] sm:$0x1] }
 0x120   :  { %493 = vtanh.f32 %v253_v9 }
 0x125   :  { %v255_v11 = vpop.f32.mrf.mxu1 }
 0x126   :  { %v673_v12 = vpop.eup %493  ;;  %v256_v14 = vadd.f32 %v667_v6, %v255_v11 }
 0x127   :  { %v306_v13 = vpack.c.bf16 %v673_v12, %v671_v10 }
 0x128   :  { %495 = vtanh.f32 %v256_v14 }
 0x129   :  { %v326_v7 = vsel %vm216_vm1, %v306_v13, 0 }
 0x12d   :  { %v257_v15 = vpop.f32.mrf.mxu1 }
 0x12e   :  { %v258_v16 = vadd.f32 %v667_v6, %v257_v15  ;;  %v679_v17 = vpop.eup %495 }
 0x130   :  { %497 = vtanh.f32 %v258_v16 }
 0x135   :  { %v260_v21 = vpop.f32.mrf.mxu1 }
 0x136   :  { %v681_v18 = vpop.eup %497  ;;  %v261_v60 = vadd.f32 %v667_v6, %v260_v21 }
 0x137   :  { %v307_v19 = vpack.c.bf16 %v681_v18, %v679_v17 }
 0x13d   :  { %v262_v23 = vpop.f32.mrf.mxu1 }
 0x13e   :  { %v263_v57 = vadd.f32 %v667_v6, %v262_v23 }
 0x145   :  { %v265_v26 = vpop.f32.mrf.mxu1 }
 0x146   :  { %v266_v54 = vadd.f32 %v667_v6, %v265_v26 }
 0x14d   :  { %v267_v28 = vpop.f32.mrf.mxu1 }
 0x14e   :  { %v268_v51 = vadd.f32 %v667_v6, %v267_v28 }
 0x155   :  { %v270_v34 = vpop.f32.mrf.mxu1 }
 0x156   :  { %v271_v48 = vadd.f32 %v667_v6, %v270_v34 }
 0x15d   :  { %v272_v43 = vpop.f32.mrf.mxu1 }
 0x15e   :  { %v273_v45 = vadd.f32 %v667_v6, %v272_v43  ;;  %v319_v9 = vpop.permute.xlu0 %318 }
 0x15f   :  { %v321_v11 = vperm.slane %v319_v9, 0 }
 0x16b   :  { %v275_v20 = vpop.f32.mrf.mxu3 }
 0x16c   :  { %v276_v41 = vadd.f32 %v667_v6, %v275_v20 }
 0x173   :  { %v277_v22 = vpop.f32.mrf.mxu3 }
 0x174   :  { %v278_v38 = vadd.f32 %v667_v6, %v277_v22 }
 0x17b   :  { %v280_v24 = vpop.f32.mrf.mxu3 }
 0x17c   :  { %v281_v33 = vadd.f32 %v667_v6, %v280_v24 }
 0x183   :  { %v282_v25 = vpop.f32.mrf.mxu3 }
 0x184   :  { %v283_v32 = vadd.f32 %v667_v6, %v282_v25 }
 0x18b   :  { %v285_v27 = vpop.f32.mrf.mxu3 }
 0x18c   :  { %v286_v29 = vadd.f32 %v667_v6, %v285_v27 }
 0x18e   :  { %499 = vtanh.f32 %v286_v29 }
 0x193   :  { %v287_v30 = vpop.f32.mrf.mxu3 }
 0x194   :  { %v288_v31 = vadd.f32 %v667_v6, %v287_v30  ;;  %v500_v35 = vpop.eup %499  ;;  %v329_v6 = vsel %vm216_vm1, %v307_v19, 0 }
 0x196   :  { %501 = vtanh.f32 %v288_v31 }
 0x197   :  { %503 = vtanh.f32 %v283_v32 }
 0x198   :  { %505 = vtanh.f32 %v281_v33 }
 0x199   :  { %507 = vtanh.f32 %v278_v38 }
 0x19a   :  { %509 = vtanh.f32 %v276_v41 }
 0x19b   :  { %511 = vtanh.f32 %v273_v45 }
 0x19c   :  { %v502_v36 = vpop.eup %501  ;;  %513 = vtanh.f32 %v271_v48 }
 0x19d   :  { %v313_v37 = vpack.c.bf16 %v502_v36, %v500_v35  ;;  %v504_v40 = vpop.eup %503  ;;  %515 = vtanh.f32 %v268_v51 }
 0x19e   :  { %v506_v42 = vpop.eup %505  ;;  %517 = vtanh.f32 %v266_v54 }
 0x19f   :  { %v347_v39 = vsel %vm216_vm1, %v313_v37, 0  ;;  %v312_v44 = vpack.c.bf16 %v504_v40, %v506_v42  ;;  %v508_v47 = vpop.eup %507  ;;  %519 = vtanh.f32 %v263_v57 }
 0x1a0   :  { %349 = vmatpush.bf16.xpose.msra.mxu2 %v347_v39  ;;  %v510_v49 = vpop.eup %509  ;;  %521 = vtanh.f32 %v261_v60 }
 0x1a1   :  { %v344_v46 = vsel %vm216_vm1, %v312_v44, 0  ;;  %v311_v50 = vpack.c.bf16 %v508_v47, %v510_v49  ;;  %v512_v53 = vpop.eup %511 }
 0x1a2   :  { %v514_v55 = vpop.eup %513 }
 0x1a3   :  { %v341_v52 = vsel %vm216_vm1, %v311_v50, 0  ;;  %v310_v56 = vpack.c.bf16 %v512_v53, %v514_v55  ;;  %v516_v59 = vpop.eup %515 }
 0x1a4   :  { %v518_v61 = vpop.eup %517 }
 0x1a5   :  { %v338_v58 = vsel %vm216_vm1, %v310_v56, 0  ;;  %v309_v62 = vpack.c.bf16 %v516_v59, %v518_v61  ;;  %v520_v1 = vpop.eup %519 }
 0x1a6   :  { %v522_v3 = vpop.eup %521 }
 0x1a7   :  { %v335_v63 = vsel %vm216_vm1, %v309_v62, 0  ;;  %v308_v4 = vpack.c.bf16 %v520_v1, %v522_v3 }
 0x1a8   :  { %350 = vmatpush.bf16.xpose.msra.mxu2 %v344_v46 }
 0x1a9   :  { %v332_v5 = vsel %vm216_vm1, %v308_v4, 0 }
 0x1b0   :  { %351 = vmatpush.bf16.xpose.msra.mxu2 %v341_v52 }
 0x1b8   :  { %352 = vmatpush.bf16.xpose.msra.mxu2 %v338_v58 }
 0x1c0   :  { %353 = vmatpush.bf16.xpose.msra.mxu2 %v335_v63 }
 0x1c8   :  { %354 = vmatpush.bf16.xpose.msra.mxu2 %v332_v5 }
 0x1d0   :  { %355 = vmatpush.bf16.xpose.msra.mxu2 %v329_v6 }
 0x1d8   :  { %356 = vmatpush.bf16.xpose.msra.mxu2 %v326_v7 }
 0x1df   :  { %439 = vmatmul.msk.bf16.vlgmr.msra.gmra.mxu2 %vm216_vm1, %v314_v8 }
 0x262   :  { %v358_v14 = vpop.f32.mrf.mxu2 }
 0x263   :  { %v359_v15 = vadd.f32 %v358_v14, %v321_v11 }
 0x265   :  { %362 = vst [vmem:[#allocation3] sm:$0x1] %v359_v15 }
 0x266   :  { %373 = dma.vmem_to_hbm [thread:$0]  %s369_s26, 16, %s371_s29, [#allocation4]  }
 0x26a   :  { %v360_v10 = vpop.f32.mrf.mxu2 }
 0x26b   :  { %547 = dma.done.wait [#allocation4], 16  }
 0x26c   :  { %548 = vsyncadd [#allocation4], 4294967280 }
 0x26d   :  { %378 = vsyncpa [#allocation4], 1 }

</bundles_post_ra>
